<compile_context>
chip_gen: v7x
topology: tpu7x:2x2x1
jax: 0.10.0
libtpu: 0.0.40
codegen_flags: <defaults>
</compile_context>

<pallas_src>
import jax
import jax.numpy as jnp
import numpy as np
from jax import lax
from jax.experimental import pallas as pl
from jax.experimental.pallas import tpu as pltpu


# ----------------------------------------------------------------------------
# Kernel factory (static shapes / packed-weight row offsets via closure)
# ----------------------------------------------------------------------------
def _make_decoder_kernel(L, H, S, tt, w_offs):
    """w_offs: list of (row_offset, n_rows) of each layer's fused [W_x ; W_hh]
    weight inside the packed (R, 4H) slab.  Row 0 of the slab is the attention
    hidden-row (padded to 4H lanes); rows 1..L are the per-layer biases."""

    def kernel(wb_ref, state0_ref, enc_ref, encterm_ref, melg_ref,
               out_ref, state_ref):
        t_blk = pl.program_id(1)

        # (Re)load the carried LSTM state at the first time-chunk of each
        # batch tile.
        @pl.when(t_blk == 0)
        def _():
            state_ref[...] = state0_ref[...]

        # ---- loop-invariant loads, hoisted out of the recurrence ----------
        enc = enc_ref[...]                                  # (tb, S, 2E)
        enc_term = encterm_ref[...]                         # (tb, S)
        attn_wh = wb_ref[0:1, :H]                           # (1, H)
        biases = [wb_ref[1 + l:2 + l, :] for l in range(L)]        # (1, 4H)
        w_fused = [wb_ref[o:o + n, :] for (o, n) in w_offs]        # (rows, 4H)

        hs0 = tuple(state_ref[l] for l in range(L))         # (tb, H)
        cs0 = tuple(state_ref[L + l] for l in range(L))

        def step(i, carry):
            hs, cs = carry

            # attention: hoisted encoder term + VPU hidden term
            hid = jnp.sum(jnp.tanh(hs[L - 1]) * attn_wh, axis=1,
                          keepdims=True)                    # (tb, 1)
            logits = enc_term + hid                         # (tb, S)
            m = jnp.max(logits, axis=1, keepdims=True)
            p = jnp.exp(logits - m)
            denom = jnp.sum(p, axis=1, keepdims=True)
            r = pl.reciprocal(denom, approx=True)           # EUP slot
            r = r * (2.0 - denom * r)                       # one Newton step
            attn = p * r                                    # (tb, S)

            if S >= 128:
                # batched (1,S)x(S,2E) MXU contraction per batch row
                ctx = lax.dot_general(
                    attn[:, None, :], enc,
                    dimension_numbers=(((2,), (1,)), ((0,), (0,))),
                    preferred_element_type=jnp.float32)[:, 0, :]
            else:
                ctx = jnp.sum(attn[:, :, None] * enc, axis=1)   # (tb, 2E)

            new_hs, new_cs = [], []
            x = ctx
            for l in range(L):
                h_prev = hs[l]
                if l == 0:
                    # mel half of the layer-0 gates was hoisted to the wrapper
                    xin = jnp.concatenate([ctx, h_prev], axis=1)
                    gates = melg_ref[i] + jnp.dot(
                        xin, w_fused[0], preferred_element_type=jnp.float32)
                else:
                    xin = jnp.concatenate([x, h_prev], axis=1)
                    gates = jnp.dot(xin, w_fused[l],
                                    preferred_element_type=jnp.float32)
                gates = gates + biases[l]

                # full-width transcendentals, then slice i/f/g/o
                sig = jax.nn.sigmoid(gates)                 # (tb, 4H)
                th = jnp.tanh(gates)                        # (tb, 4H)
                i_g = sig[:, 0 * H:1 * H]
                f_g = sig[:, 1 * H:2 * H]
                o_g = sig[:, 3 * H:4 * H]
                g_g = th[:, 2 * H:3 * H]

                c_new = f_g * cs[l] + i_g * g_g
                h_new = o_g * jnp.tanh(c_new)
                new_hs.append(h_new)
                new_cs.append(c_new)
                x = h_new

            out_ref[i] = x.astype(out_ref.dtype)            # top-layer h_t
            return tuple(new_hs), tuple(new_cs)

        hs, cs = lax.fori_loop(0, tt, step, (hs0, cs0))

        # persist (h, c) across time-chunks
        for l in range(L):
            state_ref[l] = hs[l]
            state_ref[L + l] = cs[l]

    return kernel


# ----------------------------------------------------------------------------
# Wrapper
# ----------------------------------------------------------------------------
def decoder_pallas(params, encoder_outputs, decoder_hidden, audio_targets,
                   audio_lengths=None, *, time_chunk=8):
    # audio_lengths is unused, matching the PyTorch forward (no length mask).
    h0, c0 = decoder_hidden
    B, T, M = audio_targets.shape
    _, S, E2 = encoder_outputs.shape
    L, _, H = h0.shape
    G = 4 * H

    # ---- time-invariant hoists (single XLA ops) ---------------------------
    attn_w = params['attn_w']                                  # (1, H + 2E)
    attn_we = attn_w[0, H:]                                    # (2E,)
    enc_term = (jnp.einsum('bse,e->bs', jnp.tanh(encoder_outputs), attn_we)
                + params['attn_b'][0])                         # (B, S)

    tgt_tm = jnp.transpose(audio_targets, (1, 0, 2))           # (T, B, M)
    wih0 = params['wih'][0]                                    # (M+2E, 4H)
    mel_gates = jnp.einsum('tbm,mg->tbg', tgt_tm, wih0[:M, :]) # (T, B, 4H)

    # ---- pack all weights / biases into one (R, 4H) slab -------------------
    rows = [jnp.pad(attn_w[:, :H], ((0, 0), (0, G - H)))]      # row 0
    for l in range(L):
        rows.append(params['b'][l])                            # rows 1..L
    w_offs = []
    off = 1 + L
    for l in range(L):
        if l == 0:
            wf = jnp.concatenate([wih0[M:, :], params['whh'][0]], axis=0)
        else:
            wf = jnp.concatenate([params['wih'][l], params['whh'][l]], axis=0)
        w_offs.append((off, wf.shape[0]))
        off += wf.shape[0]
        rows.append(wf)
    wb_pack = jnp.concatenate(rows, axis=0)                    # (R, 4H)

    state0 = jnp.concatenate([h0, c0], axis=0)                 # (2L, B, H)

    # ---- grid: ("parallel" batch tiles) x ("arbitrary" time chunks) -------
    tb = B   # TODO(synk): for large B, tile the batch (multiple of 8) so the
             # two v7x TensorCores each run an independent slice.
    tt = max(1, min(time_chunk, T))
    while T % tt:
        tt -= 1
    grid = (B // tb, T // tt)

    kernel = _make_decoder_kernel(L, H, S, tt, w_offs)

    h_seq = pl.pallas_call(
        kernel,
        out_shape=jax.ShapeDtypeStruct((T, B, H), jnp.float32),
        grid=grid,
        in_specs=[
            pl.BlockSpec(wb_pack.shape, lambda b, t: (0, 0)),
            pl.BlockSpec((2 * L, tb, H), lambda b, t: (0, b, 0)),
            pl.BlockSpec((tb, S, E2), lambda b, t: (b, 0, 0)),
            pl.BlockSpec((tb, S), lambda b, t: (b, 0)),
            pl.BlockSpec((tt, tb, G), lambda b, t: (t, b, 0)),
        ],
        out_specs=pl.BlockSpec((tt, tb, H), lambda b, t: (t, b, 0)),
        scratch_shapes=[pltpu.VMEM((2 * L, tb, H), jnp.float32)],
        compiler_params=pltpu.CompilerParams(
            dimension_semantics=("parallel", "arbitrary"),
            vmem_limit_bytes=32 * 1024 * 1024),
    )(wb_pack, state0, encoder_outputs, enc_term, mel_gates)

    # Output projection hoisted out of the recurrence: one dense matmul over
    # all T*B rows instead of T tiny masked (B, M) stores.
    preds = jnp.einsum('tbh,hm->tbm', h_seq, params['fc_w']) + params['fc_b']
    return jnp.transpose(preds, (1, 0, 2))                     # (B, T, M)


# ----------------------------------------------------------------------------
# Pure-JAX reference (mirrors the PyTorch forward exactly)
# ----------------------------------------------------------------------------
def decoder_reference(params, encoder_outputs, decoder_hidden, audio_targets):
    h, c = decoder_hidden
    B, T, M = audio_targets.shape
    S = encoder_outputs.shape[1]
    L, _, H = h.shape
    outs = []
    for t in range(T):
        h_top = h[-1]
        hid_rep = jnp.broadcast_to(h_top[:, None, :], (B, S, H))
        energy = jnp.tanh(jnp.concatenate([hid_rep, encoder_outputs], axis=2))
        logits = energy @ params['attn_w'][0] + params['attn_b'][0]
        aw = jax.nn.softmax(logits, axis=1)
        context = jnp.einsum('bs,bsd->bd', aw, encoder_outputs)
        x = jnp.concatenate([audio_targets[:, t, :], context], axis=1)
        new_h, new_c = [], []
        for l in range(L):
            gates = (x @ params['wih'][l] + h[l] @ params['whh'][l]
                     + params['b'][l][0])
            i = jax.nn.sigmoid(gates[:, :H])
            f = jax.nn.sigmoid(gates[:, H:2 * H])
            g = jnp.tanh(gates[:, 2 * H:3 * H])
            o = jax.nn.sigmoid(gates[:, 3 * H:4 * H])
            cn = f * c[l] + i * g
            hn = o * jnp.tanh(cn)
            new_h.append(hn)
            new_c.append(cn)
            x = hn
        h = jnp.stack(new_h)
        c = jnp.stack(new_c)
        outs.append(x @ params['fc_w'] + params['fc_b'][0])
    return jnp.stack(outs, axis=1)


# ----------------------------------------------------------------------------
# Main
# ----------------------------------------------------------------------------
if __name__ == "__main__":
    B = 2          # batch
    S = 8          # encoder sequence length
    T = 8          # decoder (audio target) sequence length
    E = 16         # encoder_hidden_dim  -> encoder features = 2E = 32
    H = 32         # decoder_hidden_dim
    L = 2          # num_layers
    M = 8          # num_mels
    IN0 = M + 2 * E   # LSTM layer-0 input size = 40

    key = jax.random.PRNGKey(0)
    ks = jax.random.split(key, 6 + 6 * L)

    def rnd(k, shape, scale=0.1):
        return scale * jax.random.normal(k, shape, dtype=jnp.float32)

    # Deterministic synthetic parameters (attention Linear kept in PyTorch
    # (out, in) layout; LSTM / fc weights stored pre-transposed so kernels can
    # right-multiply; LSTM bias = b_ih + b_hh combined).
    params = {
        'attn_w': rnd(ks[0], (1, H + 2 * E)),
        'attn_b': rnd(ks[1], (1,)),
        'fc_w':   rnd(ks[2], (H, M)),
        'fc_b':   rnd(ks[3], (1, M)),
        'wih': [], 'whh': [], 'b': [],
    }
    for l in range(L):
        in_l = IN0 if l == 0 else H
        params['wih'].append(rnd(ks[6 + 3 * l + 0], (in_l, 4 * H)))
        params['whh'].append(rnd(ks[6 + 3 * l + 1], (H, 4 * H)))
        params['b'].append(rnd(ks[6 + 3 * l + 2], (1, 4 * H)))

    k_in = jax.random.split(ks[4], 4)
    encoder_outputs = rnd(k_in[0], (B, S, 2 * E), scale=1.0)
    audio_targets = rnd(k_in[1], (B, T, M), scale=1.0)
    h0 = rnd(k_in[2], (L, B, H), scale=1.0)
    c0 = rnd(k_in[3], (L, B, H), scale=1.0)
    audio_lengths = jnp.full((B,), T, dtype=jnp.int32)   # unused, as in PyTorch

    out = decoder_pallas(params, encoder_outputs, (h0, c0), audio_targets,
                         audio_lengths)
    out = jax.block_until_ready(out)

    ref = decoder_reference(params, encoder_outputs, (h0, c0), audio_targets)
    ref = jax.block_until_ready(ref)

    # Slightly looser atol than pure-f32 division to cover the Newton-refined
    # approximate reciprocal used in the softmax normalization.
    np.testing.assert_allclose(np.asarray(out), np.asarray(ref),
                               rtol=2e-4, atol=2e-4)
    print("KERNEL_OK")
</pallas_src>

<mosaic_0001>
module attributes {stable_mosaic.version = 11 : i64} {
  func.func @kernel(%arg0: i32, %arg1: i32, %arg2: memref<131x128xf32, #tpu.memory_space<vmem>>, %arg3: memref<4x2x32xf32, #tpu.memory_space<vmem>>, %arg4: memref<2x8x32xf32, #tpu.memory_space<vmem>>, %arg5: memref<2x8xf32, #tpu.memory_space<vmem>>, %arg6: memref<8x2x128xf32, #tpu.memory_space<vmem>>, %arg7: memref<8x2x32xf32, #tpu.memory_space<vmem>>, %arg8: memref<4x2x32xf32, #tpu.memory_space<vmem>>) attributes {dimension_semantics = [#tpu.dimension_semantics<parallel>, #tpu.dimension_semantics<arbitrary>], iteration_bounds = array<i64: 1, 1>, scalar_prefetch = 0 : i64, scratch_operands = 1 : i64, tpu.core_type = #tpu.core_type<tc>, window_params = [{pipeline_mode = #tpu.pipeline_mode<synchronous>, transform_indices = @transform_0, window_bounds = array<i64: 131, 128>}, {transform_indices = @transform_1, window_bounds = array<i64: 4, 2, 32>}, {transform_indices = @transform_2, window_bounds = array<i64: 2, 8, 32>}, {transform_indices = @transform_3, window_bounds = array<i64: 2, 8>}, {transform_indices = @transform_4, window_bounds = array<i64: 8, 2, 128>}, {transform_indices = @transform_5, window_bounds = array<i64: 8, 2, 32>}]} {
    %c0_i32 = arith.constant 0 : i32
    %0 = arith.cmpi eq, %arg1, %c0_i32 : i32
    %1 = arith.extui %0 : i1 to i32
    %c0_i32_0 = arith.constant 0 : i32
    %2 = arith.cmpi ne, %1, %c0_i32_0 : i32
    scf.if %2 {
      %c0_37 = arith.constant 0 : index
      %c0_38 = arith.constant 0 : index
      %c0_39 = arith.constant 0 : index
      %32 = vector.load %arg3[%c0_37, %c0_38, %c0_39] : memref<4x2x32xf32, #tpu.memory_space<vmem>>, vector<4x2x32xf32>
      %c0_40 = arith.constant 0 : index
      %c0_41 = arith.constant 0 : index
      %c0_42 = arith.constant 0 : index
      %33 = vector.load %arg8[%c0_40, %c0_41, %c0_42] : memref<4x2x32xf32, #tpu.memory_space<vmem>>, vector<4x2x32xf32>
      tpu.vector_store %arg8[%c0_40, %c0_41, %c0_42], %32 {strides = array<i32>} : memref<4x2x32xf32, #tpu.memory_space<vmem>>, vector<4x2x32xf32>,
    } else {
    }
    %c0 = arith.constant 0 : index
    %c0_1 = arith.constant 0 : index
    %c0_2 = arith.constant 0 : index
    %3 = vector.load %arg4[%c0, %c0_1, %c0_2] : memref<2x8x32xf32, #tpu.memory_space<vmem>>, vector<2x8x32xf32>
    %c0_3 = arith.constant 0 : index
    %c0_4 = arith.constant 0 : index
    %4 = vector.load %arg5[%c0_3, %c0_4] : memref<2x8xf32, #tpu.memory_space<vmem>>, vector<2x8xf32>
    %c0_5 = arith.constant 0 : index
    %c0_6 = arith.constant 0 : index
    %5 = vector.load %arg2[%c0_5, %c0_6] : memref<131x128xf32, #tpu.memory_space<vmem>>, vector<1x32xf32>
    %c1 = arith.constant 1 : index
    %c0_7 = arith.constant 0 : index
    %6 = vector.load %arg2[%c1, %c0_7] : memref<131x128xf32, #tpu.memory_space<vmem>>, vector<1x128xf32>
    %c2 = arith.constant 2 : index
    %c0_8 = arith.constant 0 : index
    %7 = vector.load %arg2[%c2, %c0_8] : memref<131x128xf32, #tpu.memory_space<vmem>>, vector<1x128xf32>
    %c3 = arith.constant 3 : index
    %c0_9 = arith.constant 0 : index
    %8 = vector.load %arg2[%c3, %c0_9] : memref<131x128xf32, #tpu.memory_space<vmem>>, vector<64x128xf32>
    %c67 = arith.constant 67 : index
    %c0_10 = arith.constant 0 : index
    %9 = vector.load %arg2[%c67, %c0_10] : memref<131x128xf32, #tpu.memory_space<vmem>>, vector<64x128xf32>
    %c0_11 = arith.constant 0 : index
    %c0_12 = arith.constant 0 : index
    %c0_13 = arith.constant 0 : index
    %10 = vector.load %arg8[%c0_11, %c0_12, %c0_13] : memref<4x2x32xf32, #tpu.memory_space<vmem>>, vector<1x2x32xf32>
    %11 = vector.shape_cast %10 : vector<1x2x32xf32> to vector<2x32xf32>
    %c1_14 = arith.constant 1 : index
    %c0_15 = arith.constant 0 : index
    %c0_16 = arith.constant 0 : index
    %12 = vector.load %arg8[%c1_14, %c0_15, %c0_16] : memref<4x2x32xf32, #tpu.memory_space<vmem>>, vector<1x2x32xf32>
    %13 = vector.shape_cast %12 : vector<1x2x32xf32> to vector<2x32xf32>
    %c2_17 = arith.constant 2 : index
    %c0_18 = arith.constant 0 : index
    %c0_19 = arith.constant 0 : index
    %14 = vector.load %arg8[%c2_17, %c0_18, %c0_19] : memref<4x2x32xf32, #tpu.memory_space<vmem>>, vector<1x2x32xf32>
    %15 = vector.shape_cast %14 : vector<1x2x32xf32> to vector<2x32xf32>
    %c3_20 = arith.constant 3 : index
    %c0_21 = arith.constant 0 : index
    %c0_22 = arith.constant 0 : index
    %16 = vector.load %arg8[%c3_20, %c0_21, %c0_22] : memref<4x2x32xf32, #tpu.memory_space<vmem>>, vector<1x2x32xf32>
    %17 = vector.shape_cast %16 : vector<1x2x32xf32> to vector<2x32xf32>
    %c0_i32_23 = arith.constant 0 : i32
    %c8_i32 = arith.constant 8 : i32
    %18 = arith.addi %c0_i32_23, %c8_i32 : i32
    %c1_i32 = arith.constant 1 : i32
    %19:4 = scf.for %arg9 = %c0_i32_23 to %18 step %c1_i32 iter_args(%arg10 = %11, %arg11 = %13, %arg12 = %15, %arg13 = %17) -> (vector<2x32xf32>, vector<2x32xf32>, vector<2x32xf32>, vector<2x32xf32>)  : i32 {
      %32 = math.tanh %arg11 : vector<2x32xf32>
      %33 = vector.broadcast %5 : vector<1x32xf32> to vector<2x32xf32>
      %34 = arith.mulf %32, %33 : vector<2x32xf32>
      %cst = arith.constant dense<0.000000e+00> : vector<2xf32>
      %35 = vector.multi_reduction <add>, %34, %cst [1] : vector<2x32xf32> to vector<2xf32>
      %36 = vector.shape_cast %35 : vector<2xf32> to vector<2x1xf32>
      %37 = vector.broadcast %36 : vector<2x1xf32> to vector<2x8xf32>
      %38 = arith.addf %4, %37 : vector<2x8xf32>
      %cst_37 = arith.constant dense<0xFF800000> : vector<2xf32>
      %39 = vector.multi_reduction <maximumf>, %38, %cst_37 [1] : vector<2x8xf32> to vector<2xf32>
      %40 = vector.shape_cast %39 : vector<2xf32> to vector<2x1xf32>
      %41 = vector.broadcast %40 : vector<2x1xf32> to vector<2x8xf32>
      %42 = arith.subf %38, %41 : vector<2x8xf32>
      %43 = math.exp %42 : vector<2x8xf32>
      %cst_38 = arith.constant dense<0.000000e+00> : vector<2xf32>
      %44 = vector.multi_reduction <add>, %43, %cst_38 [1] : vector<2x8xf32> to vector<2xf32>
      %45 = vector.shape_cast %44 : vector<2xf32> to vector<2x1xf32>
      %46 = tpu.reciprocal %45 {approx = true} : vector<2x1xf32> -> vector<2x1xf32>
      %47 = arith.mulf %45, %46 : vector<2x1xf32>
      %cst_39 = arith.constant 2.000000e+00 : f32
      %48 = vector.broadcast %cst_39 : f32 to vector<2x1xf32>
      %49 = arith.subf %48, %47 : vector<2x1xf32>
      %50 = arith.mulf %46, %49 : vector<2x1xf32>
      %51 = vector.broadcast %50 : vector<2x1xf32> to vector<2x8xf32>
      %52 = arith.mulf %43, %51 : vector<2x8xf32>
      %53 = vector.shape_cast %52 : vector<2x8xf32> to vector<2x8x1xf32>
      %54 = vector.broadcast %53 : vector<2x8x1xf32> to vector<2x8x32xf32>
      %55 = arith.mulf %54, %3 : vector<2x8x32xf32>
      %cst_40 = arith.constant dense<0.000000e+00> : vector<2x32xf32>
      %56 = vector.multi_reduction <add>, %55, %cst_40 [1] : vector<2x8x32xf32> to vector<2x32xf32>
      %57 = tpu.concatenate %56, %arg10 in 1 : vector<2x32xf32>, vector<2x32xf32> -> vector<2x64xf32>
      %58 = arith.index_cast %arg9 : i32 to index
      %c0_41 = arith.constant 0 : index
      %c0_42 = arith.constant 0 : index
      %59 = vector.load %arg6[%58, %c0_41, %c0_42] : memref<8x2x128xf32, #tpu.memory_space<vmem>>, vector<1x2x128xf32>
      %60 = vector.shape_cast %59 : vector<1x2x128xf32> to vector<2x128xf32>
      %cst_43 = arith.constant dense<0.000000e+00> : vector<2x128xf32>
      %61 = tpu.matmul %57, %8, %cst_43 {dimension_numbers = #tpu.dot_dimension_numbers<[1], [0], [0], [1], [0, 0, 1, 1], [], []>} : vector<2x64xf32>, vector<64x128xf32>, vector<2x128xf32> -> vector<2x128xf32>
      %62 = arith.addf %60, %61 : vector<2x128xf32>
      %63 = vector.broadcast %6 : vector<1x128xf32> to vector<2x128xf32>
      %64 = arith.addf %62, %63 : vector<2x128xf32>
      %65 = arith.negf %64 : vector<2x128xf32>
      %66 = math.exp %65 : vector<2x128xf32>
      %cst_44 = arith.constant 1.000000e+00 : f32
      %67 = vector.broadcast %cst_44 : f32 to vector<2x128xf32>
      %68 = arith.addf %67, %66 : vector<2x128xf32>
      %69 = arith.divf %67, %68 : vector<2x128xf32>
      %70 = math.tanh %64 : vector<2x128xf32>
      %71 = vector.extract_strided_slice %69 {offsets = [0, 0], sizes = [2, 32], strides = [1, 1]} : vector<2x128xf32> to vector<2x32xf32>
      %72 = vector.extract_strided_slice %69 {offsets = [0, 32], sizes = [2, 32], strides = [1, 1]} : vector<2x128xf32> to vector<2x32xf32>
      %73 = vector.extract_strided_slice %69 {offsets = [0, 96], sizes = [2, 32], strides = [1, 1]} : vector<2x128xf32> to vector<2x32xf32>
      %74 = vector.extract_strided_slice %70 {offsets = [0, 64], sizes = [2, 32], strides = [1, 1]} : vector<2x128xf32> to vector<2x32xf32>
      %75 = arith.mulf %72, %arg12 : vector<2x32xf32>
      %76 = arith.mulf %71, %74 : vector<2x32xf32>
      %77 = arith.addf %75, %76 : vector<2x32xf32>
      %78 = math.tanh %77 : vector<2x32xf32>
      %79 = arith.mulf %73, %78 : vector<2x32xf32>
      %80 = tpu.concatenate %79, %arg11 in 1 : vector<2x32xf32>, vector<2x32xf32> -> vector<2x64xf32>
      %cst_45 = arith.constant dense<0.000000e+00> : vector<2x128xf32>
      %81 = tpu.matmul %80, %9, %cst_45 {dimension_numbers = #tpu.dot_dimension_numbers<[1], [0], [0], [1], [0, 0, 1, 1], [], []>} : vector<2x64xf32>, vector<64x128xf32>, vector<2x128xf32> -> vector<2x128xf32>
      %82 = vector.broadcast %7 : vector<1x128xf32> to vector<2x128xf32>
      %83 = arith.addf %81, %82 : vector<2x128xf32>
      %84 = arith.negf %83 : vector<2x128xf32>
      %85 = math.exp %84 : vector<2x128xf32>
      %cst_46 = arith.constant 1.000000e+00 : f32
      %86 = vector.broadcast %cst_46 : f32 to vector<2x128xf32>
      %87 = arith.addf %86, %85 : vector<2x128xf32>
      %88 = arith.divf %86, %87 : vector<2x128xf32>
      %89 = math.tanh %83 : vector<2x128xf32>
      %90 = vector.extract_strided_slice %88 {offsets = [0, 0], sizes = [2, 32], strides = [1, 1]} : vector<2x128xf32> to vector<2x32xf32>
      %91 = vector.extract_strided_slice %88 {offsets = [0, 32], sizes = [2, 32], strides = [1, 1]} : vector<2x128xf32> to vector<2x32xf32>
      %92 = vector.extract_strided_slice %88 {offsets = [0, 96], sizes = [2, 32], strides = [1, 1]} : vector<2x128xf32> to vector<2x32xf32>
      %93 = vector.extract_strided_slice %89 {offsets = [0, 64], sizes = [2, 32], strides = [1, 1]} : vector<2x128xf32> to vector<2x32xf32>
      %94 = arith.mulf %91, %arg13 : vector<2x32xf32>
      %95 = arith.mulf %90, %93 : vector<2x32xf32>
      %96 = arith.addf %94, %95 : vector<2x32xf32>
      %97 = math.tanh %96 : vector<2x32xf32>
      %98 = arith.mulf %92, %97 : vector<2x32xf32>
      %99 = arith.index_cast %arg9 : i32 to index
      %c0_47 = arith.constant 0 : index
      %c0_48 = arith.constant 0 : index
      %100 = vector.load %arg7[%99, %c0_47, %c0_48] : memref<8x2x32xf32, #tpu.memory_space<vmem>>, vector<1x2x32xf32>
      %101 = vector.shape_cast %100 : vector<1x2x32xf32> to vector<2x32xf32>
      %102 = vector.shape_cast %98 : vector<2x32xf32> to vector<1x2x32xf32>
      tpu.vector_store %arg7[%99, %c0_47, %c0_48], %102 {strides = array<i32>} : memref<8x2x32xf32, #tpu.memory_space<vmem>>, vector<1x2x32xf32>,
      scf.yield %79, %98, %77, %96 : vector<2x32xf32>, vector<2x32xf32>, vector<2x32xf32>, vector<2x32xf32>
    }
    %c8_i32_24 = arith.constant 8 : i32
    %c0_25 = arith.constant 0 : index
    %c0_26 = arith.constant 0 : index
    %c0_27 = arith.constant 0 : index
    %20 = vector.load %arg8[%c0_25, %c0_26, %c0_27] : memref<4x2x32xf32, #tpu.memory_space<vmem>>, vector<1x2x32xf32>
    %21 = vector.shape_cast %20 : vector<1x2x32xf32> to vector<2x32xf32>
    %22 = vector.shape_cast %19#0 : vector<2x32xf32> to vector<1x2x32xf32>
    tpu.vector_store %arg8[%c0_25, %c0_26, %c0_27], %22 {strides = array<i32>} : memref<4x2x32xf32, #tpu.memory_space<vmem>>, vector<1x2x32xf32>,
    %c2_28 = arith.constant 2 : index
    %c0_29 = arith.constant 0 : index
    %c0_30 = arith.constant 0 : index
    %23 = vector.load %arg8[%c2_28, %c0_29, %c0_30] : memref<4x2x32xf32, #tpu.memory_space<vmem>>, vector<1x2x32xf32>
    %24 = vector.shape_cast %23 : vector<1x2x32xf32> to vector<2x32xf32>
    %25 = vector.shape_cast %19#2 : vector<2x32xf32> to vector<1x2x32xf32>
    tpu.vector_store %arg8[%c2_28, %c0_29, %c0_30], %25 {strides = array<i32>} : memref<4x2x32xf32, #tpu.memory_space<vmem>>, vector<1x2x32xf32>,
    %c1_31 = arith.constant 1 : index
    %c0_32 = arith.constant 0 : index
    %c0_33 = arith.constant 0 : index
    %26 = vector.load %arg8[%c1_31, %c0_32, %c0_33] : memref<4x2x32xf32, #tpu.memory_space<vmem>>, vector<1x2x32xf32>
    %27 = vector.shape_cast %26 : vector<1x2x32xf32> to vector<2x32xf32>
    %28 = vector.shape_cast %19#1 : vector<2x32xf32> to vector<1x2x32xf32>
    tpu.vector_store %arg8[%c1_31, %c0_32, %c0_33], %28 {strides = array<i32>} : memref<4x2x32xf32, #tpu.memory_space<vmem>>, vector<1x2x32xf32>,
    %c3_34 = arith.constant 3 : index
    %c0_35 = arith.constant 0 : index
    %c0_36 = arith.constant 0 : index
    %29 = vector.load %arg8[%c3_34, %c0_35, %c0_36] : memref<4x2x32xf32, #tpu.memory_space<vmem>>, vector<1x2x32xf32>
    %30 = vector.shape_cast %29 : vector<1x2x32xf32> to vector<2x32xf32>
    %31 = vector.shape_cast %19#3 : vector<2x32xf32> to vector<1x2x32xf32>
    tpu.vector_store %arg8[%c3_34, %c0_35, %c0_36], %31 {strides = array<i32>} : memref<4x2x32xf32, #tpu.memory_space<vmem>>, vector<1x2x32xf32>,
    return
  }
  func.func @transform_0(%arg0: i32, %arg1: i32) -> (i32, i32) {
    %c0_i32 = arith.constant 0 : i32
    %c0_i32_0 = arith.constant 0 : i32
    %c0_i32_1 = arith.constant 0 : i32
    return %c0_i32, %c0_i32_0 : i32, i32
  }
  func.func @transform_1(%arg0: i32, %arg1: i32) -> (i32, i32, i32) {
    %c0_i32 = arith.constant 0 : i32
    %c0_i32_0 = arith.constant 0 : i32
    %c0_i32_1 = arith.constant 0 : i32
    return %c0_i32, %arg0, %c0_i32_0 : i32, i32, i32
  }
  func.func @transform_2(%arg0: i32, %arg1: i32) -> (i32, i32, i32) {
    %c0_i32 = arith.constant 0 : i32
    %c0_i32_0 = arith.constant 0 : i32
    %c0_i32_1 = arith.constant 0 : i32
    return %arg0, %c0_i32, %c0_i32_0 : i32, i32, i32
  }
  func.func @transform_3(%arg0: i32, %arg1: i32) -> (i32, i32) {
    %c0_i32 = arith.constant 0 : i32
    %c0_i32_0 = arith.constant 0 : i32
    return %arg0, %c0_i32 : i32, i32
  }
  func.func @transform_4(%arg0: i32, %arg1: i32) -> (i32, i32, i32) {
    %c0_i32 = arith.constant 0 : i32
    %c0_i32_0 = arith.constant 0 : i32
    return %arg1, %arg0, %c0_i32 : i32, i32, i32
  }
  func.func @transform_5(%arg0: i32, %arg1: i32) -> (i32, i32, i32) {
    %c0_i32 = arith.constant 0 : i32
    %c0_i32_0 = arith.constant 0 : i32
    return %arg1, %arg0, %c0_i32 : i32, i32, i32
  }
}

</mosaic_0001>

<bundles_post_ra>
// kernel: tpu_custom_call.1
= control target key start
LH: loop header
LB: loop body
LE: loop exit
PB: predicated region body
PF: predicated region fallthrough
CT: control target
= control target key end

     0   :  { %10 = vsyncpa [#allocation4], 0  ;;  %s1071_s0 = inlined_call_operand.hbm [shape: f32[131,128], index: 0, kind: input, shape index: {}]   ;;  %s1072_s1 = inlined_call_operand.hbm [shape: f32[4,2,32], index: 1, kind: input, shape index: {}]   ;;  %s1073_s2 = inlined_call_operand.hbm [shape: f32[2,8,32], index: 2, kind: input, shape index: {}]   ;;  %s1074_s3 = inlined_call_operand.vmem [shape: f32[2,8], index: 3, kind: input, shape index: {}]   ;;  %s1075_s4 = inlined_call_operand.hbm [shape: f32[8,2,128], index: 4, kind: input, shape index: {}]   ;;  %s1076_s5 = inlined_call_operand.hbm [shape: f32[8,2,32], index: 5, kind: output, shape index: {}]  }
   0x1   :  { %11 = vsyncpa [#allocation7], 0 }
   0x2   :  { %12 = vsyncpa [#allocation10], 0 }
   0x3   :  { %13 = vsyncpa [#allocation5], 0  ;;  %s802_s18 = smov [#allocation6]   ;;  %s644_s22 = scalar_lea.hbm %s1072_s1, 128 }
   0x4   :  { %s31_s19 = sshll.u32 %s802_s18, 4  ;;  %p645_p0 = scmp.ne.s32.totalorder %s1072_s1, %s644_s22  ;;  %s32_s19 = int_to_ptr.vmem [resolvable:$true] %s31_s19 }
   0x5   :  { %p648_p1 = scmp.lt.u32.totalorder %s644_s22, %s1072_s1 }
   0x7   :  { %p650_p2 = pnand %p648_p1, %p645_p0 }
   0x9   :  { %653 = shalt.err (!%p650_p2)
}
   0xa   :  { %s654_s27 = scalar_lea.vmem %s32_s19, 128  ;;  %p659_p4 = scmp.lt.s32.totalorder %s32_s19, %s32_s19 }
   0xb   :  { %p655_p3 = scmp.ne.s32.totalorder %s32_s19, %s654_s27  ;;  %p660_p5 = scmp.lt.s32.totalorder %s654_s27, %s654_s27 }
   0xd   :  { %p661_p6 = por %p660_p5, %p659_p4 }
   0xf   :  { %p662_p7 = pnand %p661_p6, %p655_p3 }
  0x11   :  { %665 = shalt.err (!%p662_p7)
}
  0x12   :  { %s803_s28 = smov 32   ;;  %s804_s29 = smov 2  }
  0x13   :  { %37 = dma.hbm_to_vmem [thread:$0]  %s1072_s1, 128, %s32_s19, [#allocation7], %s803_s28, %s803_s28, %s804_s29  }
  0x14   :  { %s805_s7 = smov [#allocation3]   ;;  %s666_s11 = scalar_lea.hbm %s1071_s0, 2176 }
  0x15   :  { %s19_s8 = sshll.u32 %s805_s7, 4  ;;  %p667_p8 = scmp.ne.s32.totalorder %s1071_s0, %s666_s11  ;;  %s20_s8 = int_to_ptr.vmem [resolvable:$true] %s19_s8 }
  0x16   :  { %p670_p9 = scmp.lt.u32.totalorder %s666_s11, %s1071_s0 }
  0x18   :  { %p672_p10 = pnand %p670_p9, %p667_p8 }
  0x1a   :  { %675 = shalt.err (!%p672_p10)
}
  0x1b   :  { %s676_s16 = scalar_lea.vmem %s20_s8, 2176  ;;  %p681_p12 = scmp.lt.s32.totalorder %s20_s8, %s20_s8 }
  0x1c   :  { %p677_p11 = scmp.ne.s32.totalorder %s20_s8, %s676_s16  ;;  %p682_p13 = scmp.lt.s32.totalorder %s676_s16, %s676_s16 }
  0x1e   :  { %p683_p0 = por %p682_p13, %p681_p12 }
  0x20   :  { %p684_p1 = pnand %p683_p0, %p677_p11 }
  0x22   :  { %687 = shalt.err (!%p684_p1)
}
  0x23   :  { %s806_s1 = smov 128   ;;  %s807_s17 = smov 8  }
  0x24   :  { %25 = dma.hbm_to_vmem [thread:$0]  %s1071_s0, 2176, %s20_s8, [#allocation4], %s806_s1, %s806_s1, %s807_s17  }
  0x25   :  { %s808_s20 = smov [#allocation8]   ;;  %s809_s22 = smov [#allocation9]  }
  0x26   :  { %s43_s21 = sshll.u32 %s808_s20, 4  ;;  %s57_s23 = sshll.u32 %s809_s22, 4  ;;  %s44_s21 = int_to_ptr.vmem [resolvable:$true] %s43_s21  ;;  %s874_s23 = int_to_ptr.vmem [resolvable:$true] %s57_s23 }
  0x27   :  { %s688_s26 = scalar_lea.hbm %s1073_s2, 256 }
  0x28   :  { %p689_p2 = scmp.ne.s32.totalorder %s1073_s2, %s688_s26  ;;  %p692_p3 = scmp.lt.u32.totalorder %s688_s26, %s1073_s2 }
  0x2a   :  { %p694_p4 = pnand %p692_p3, %p689_p2 }
  0x2c   :  { %697 = shalt.err (!%p694_p4)
}
  0x2d   :  { %s698_s0 = scalar_lea.vmem %s44_s21, 256  ;;  %p703_p6 = scmp.lt.s32.totalorder %s44_s21, %s44_s21 }
  0x2e   :  { %p699_p5 = scmp.ne.s32.totalorder %s44_s21, %s698_s0  ;;  %p704_p7 = scmp.lt.s32.totalorder %s698_s0, %s698_s0 }
  0x30   :  { %p705_p8 = por %p704_p7, %p703_p6 }
  0x32   :  { %p706_p9 = pnand %p705_p8, %p699_p5 }
  0x34   :  { %709 = shalt.err (!%p706_p9)
}
  0x35   :  { %49 = dma.hbm_to_vmem [thread:$0]  %s1073_s2, 256, %s44_s21, [#allocation7], %s806_s1, %s806_s1, %s807_s17  }
  0x36   :  { %s710_s12 = scalar_lea.hbm %s1075_s4, 256 }
  0x37   :  { %p711_p10 = scmp.ne.s32.totalorder %s1075_s4, %s710_s12  ;;  %p714_p11 = scmp.lt.u32.totalorder %s710_s12, %s1075_s4 }
  0x39   :  { %p716_p12 = pnand %p714_p11, %p711_p10 }
  0x3b   :  { %719 = shalt.err (!%p716_p12)
}
  0x3c   :  { %s720_s18 = scalar_lea.vmem %s874_s23, 256  ;;  %p725_p0 = scmp.lt.s32.totalorder %s874_s23, %s874_s23 }
  0x3d   :  { %p721_p13 = scmp.ne.s32.totalorder %s874_s23, %s720_s18  ;;  %p726_p1 = scmp.lt.s32.totalorder %s720_s18, %s720_s18 }
  0x3f   :  { %p727_p2 = por %p726_p1, %p725_p0 }
  0x41   :  { %p728_p3 = pnand %p727_p2, %p721_p13 }
  0x43   :  { %731 = shalt.err (!%p728_p3)
}
  0x44   :  { %63 = dma.hbm_to_vmem [thread:$0]  %s1075_s4, 256, %s874_s23, [#allocation10], %s803_s28, %s803_s28, %s804_s29  }
  0x45   :  { %774 = dma.done.wait [#allocation4], 2176  }
  0x46   :  { %775 = vsyncadd [#allocation4], 4294965120 }
  0x47   :  { %776 = dma.done.wait [#allocation7], 384  }
  0x48   :  { %777 = vsyncadd [#allocation7], 4294966912 }
  0x49   :  { %778 = dma.done.wait [#allocation10], 256  }
  0x4a   :  { %779 = vsyncadd [#allocation10], 4294967040  ;;  %v908_v0 = vld [vmem:[#allocation8] sm:$0xff]  ;;  %v910_v1 = vld [vmem:[#allocation8 + $0x8] sm:$0xff]  ;;  %vm84_vm0 = vcmask 254976  }
  0x4b   :  { %v915_v2 = vld [vmem:[%s1074_s3] sm:$0x3]  ;;  %v917_v3 = vld [vmem:[#allocation3] ss:$0 sm:$0xff]  ;;  %v919_v4 = vld [vmem:[#allocation3 + $0x1] ss:$0 sm:$0xff] }
  0x4c   :  { %v921_v5 = vld [vmem:[#allocation3 + $0x2] ss:$0 sm:$0xff]  ;;  %v923_v6 = vld [vmem:[#allocation3 + $0x3] sm:$0xff]  ;;  %v925_v7 = vld [vmem:[#allocation3 + $0xb] sm:$0xff]  ;;  %s967_s3 = smov 0  }
  0x4d   :  { %v927_v8 = vld [vmem:[#allocation3 + $0x13] sm:$0xff]  ;;  %v929_v9 = vld [vmem:[#allocation3 + $0x1b] sm:$0xff]  ;;  %v931_v10 = vld [vmem:[#allocation3 + $0x23] sm:$0xff] }
  0x4e   :  { %v933_v11 = vld [vmem:[#allocation3 + $0x2b] sm:$0xff]  ;;  %v935_v12 = vld [vmem:[#allocation3 + $0x33] sm:$0xff]  ;;  %v937_v13 = vld [vmem:[#allocation3 + $0x3b] sm:$0xff] }
  0x4f   :  { %v939_v14 = vld [vmem:[#allocation3 + $0x43] sm:$0xff]  ;;  %v941_v15 = vld [vmem:[#allocation3 + $0x4b] sm:$0xff]  ;;  %v943_v16 = vld [vmem:[#allocation3 + $0x53] sm:$0xff] }
  0x50   :  { %v945_v17 = vld [vmem:[#allocation3 + $0x5b] sm:$0xff]  ;;  %v947_v18 = vld [vmem:[#allocation3 + $0x63] sm:$0xff]  ;;  %v949_v19 = vld [vmem:[#allocation3 + $0x6b] sm:$0xff] }
  0x51   :  { %v951_v20 = vld [vmem:[#allocation3 + $0x73] sm:$0xff]  ;;  %v953_v21 = vld [vmem:[#allocation3 + $0x7b] sm:$0xff]  ;;  %v80_v22 = vld [vmem:[#allocation6] sm:$0x3] }
  0x52   :  { %v81_v23 = vld [vmem:[#allocation6 + $0x2] sm:$0x3]  ;;  %85 = vst.msk [vmem:[#allocation2] sm:$0x3] %vm84_vm0, %v80_v22  ;;  %v82_v24 = vld [vmem:[#allocation6 + $0x4] sm:$0x3] }
  0x53   :  { %86 = vst.msk [vmem:[#allocation2 + $0x2] sm:$0x3] %vm84_vm0, %v81_v23  ;;  %v83_v25 = vld [vmem:[#allocation6 + $0x6] sm:$0x3]  ;;  %87 = vst.msk [vmem:[#allocation2 + $0x4] sm:$0x3] %vm84_vm0, %v82_v24 }
  0x54   :  { %88 = vst.msk [vmem:[#allocation2 + $0x6] sm:$0x3] %vm84_vm0, %v83_v25 }
  0x59   :  { %v111_v26 = vld [vmem:[#allocation2] sm:$0x3]  }
  0x5a   :  { %v113_v27 = vld [vmem:[#allocation2 + $0x2] sm:$0x3]   ;;  %v115_v28 = vld [vmem:[#allocation2 + $0x4] sm:$0x3]  }
  0x5b   :  { %v117_v29 = vld [vmem:[#allocation2 + $0x6] sm:$0x3]  }
  0x5c LB: > { %622 = vtanh.f32 %v792_v27  ;;  %vm139_vm1 = vcmask 58368   ;;  %v154_v42 = vlaneseq  ;;  %v544_v43 = vpack.c.bf16 %v925_v7, %v923_v6  ;;  %s813_s4 = smov 32   ;;  %s480_s20 = sshll.u32 %s800_s3, 1  ;;  %s800_s3 = sphi %s967_s3, %s123_s3   ;;  %v796_v26 = vphi %v111_v26, %v1080_v26   ;;  %v792_v27 = vphi %v113_v27, %v1079_v27   ;;  %v788_v28 = vphi %v115_v28, %v1078_v28   ;;  %v784_v29 = vphi %v117_v29, %v1077_v29  }
  0x5d   : > { %v810_v44 = vmov 0.0|0.0   ;;  %v547_v48 = vpack.c.bf16 %v929_v9, %v927_v8  ;;  %v550_v53 = vpack.c.bf16 %v933_v11, %v931_v10  ;;  %v553_v57 = vpack.c.bf16 %v937_v13, %v935_v12  ;;  %s196_s21 = scalar_lea.vmem [#allocation9], %s480_s20  ;;  %s814_s22 = smov 64  }
  0x5e   : > { %543 = vmatprep.subr.bf16.mxu0 %v810_v44  ;;  %555 = vmatprep.subr.bf16.mxu1 %v810_v44  ;;  %v155_v47 = vshrl.u32 %v154_v42, 7  ;;  %vm811_vm2 = vmmov 0   ;;  %v812_v58 = vmov 0.0   ;;  %vm170_vm3 = vcmask 261120   ;;  %s815_s23 = smov 96   ;;  %s424_s24 = scalar_lea.vmem [#allocation11], %s480_s20 }
  0x5f   : > { %545 = vmatpush3.bf16.msra.mxu0 %v544_v43  ;;  %521 = vmatprep.mubr.msk.f32.mxu0 %vm811_vm2, %v812_v58  ;;  %vm187_vm4 = vcmask 1041409   ;;  %vm198_vm5 = vcmask 523264   ;;  %s123_s3 = sadd.s32 1, %s800_s3  }
  0x60   : > { %546 = vmatprep.subr.bf16.mxu0 %v810_v44  ;;  %v163_v51 = vsub.s32 1, %v155_v47  ;;  %v156_v52 = vsub.s32 0, %v155_v47  ;;  %540 = vmatprep.mubr.msk.f32.mxu1 %vm811_vm2, %v812_v58  ;;  %v556_v58 = vpack.c.bf16 %v941_v15, %v939_v14  ;;  %p120_p4 = scmp.ge.s32.totalorder %s123_s3, 8  }
  0x61   :  { %s816_s25 = smov (%p120_p4), [#allocation11]  }
  0x62   : > { %557 = vmatpush3.bf16.msra.mxu1 %v556_v58  ;;  %s444_s26 = sshll.u32 (%p120_p4), %s816_s25, 4  ;;  %s445_s26 = int_to_ptr.vmem [resolvable:$true] %s444_s26 }
  0x63   : > { %548 = vmatpush3.bf16.msra.mxu0 %v547_v48  ;;  %558 = vmatprep.subr.bf16.mxu1 %v810_v44  ;;  %s732_s27 = scalar_lea.vmem (%p120_p4), %s445_s26, 256  ;;  %p737_p6 = scmp.lt.s32.totalorder (%p120_p4), %s445_s26, %s445_s26 }
  0x64   : > { %549 = vmatprep.subr.bf16.mxu0 %v810_v44  ;;  %p733_p5 = scmp.ne.s32.totalorder (%p120_p4), %s445_s26, %s732_s27  ;;  %p738_p7 = scmp.lt.s32.totalorder (%p120_p4), %s732_s27, %s732_s27 }
  0x66   : > { %v623_v30 = vpop.eup %622  ;;  %p739_p8 = por (%p120_p4), %p738_p7, %p737_p6 }
  0x67   : > { %v133_v31 = vmul.f32 %v623_v30, %v917_v3  ;;  %551 = vmatpush3.bf16.msra.mxu0 %v550_v53 }
  0x68   : > { %552 = vmatprep.subr.bf16.mxu0 %v810_v44  ;;  %p740_p9 = pnand (%p120_p4), %p739_p8, %p733_p5 }
  0x69   : > { %v135_v32 = vsel %vm84_vm0, %v133_v31, 0.0 }
  0x6a   : > { %136 = vadd.xlane.f32.xlu0 %v135_v32 }
  0x6b   : > { %554 = vmatpush3.bf16.msra.mxu0 %v553_v57 }
  0xf7   : > { %v137_v33 = vpop.xlane.xlu0 %136 }
  0xf8   : > { %v138_v34 = vadd.f32 %v137_v33, %v915_v2 }
  0xfa   : > { %v140_v35 = vsel %vm139_vm1, %v138_v34, -inf }
  0xfb   : > { %141 = vmax.xlane.f32.xlu0 %v140_v35 }
 0x188   : > { %v142_v36 = vpop.xlane.xlu0 %141 }
 0x189   : > { %v143_v37 = vsub.f32 %v138_v34, %v142_v36 }
 0x18b   : > { %v144_v38 = vmul.f32 1.442695, %v143_v37 }
 0x18d   : > { %624 = vpow2.f32 %v144_v38 }
 0x197   : > { %v625_v39 = vpop.eup %624 }
 0x198   : > { %v146_v40 = vsel %vm139_vm1, %v625_v39, 0.0 }
 0x199   : > { %147 = vadd.xlane.f32.xlu1 %v146_v40 }
 0x226   : > { %v148_v41 = vpop.xlane.xlu1 %147 }
 0x227   : > { %626 = vrcp.f32 %v148_v41 }
 0x231   : > { %v627_v45 = vpop.eup %626 }
 0x232   : > { %v150_v46 = vmul.f32 %v627_v45, %v148_v41  ;;  %v197_v41 = vld [vmem:[%s196_s21] sm:$0x3] }
 0x234   : > { %v151_v49 = vsub.f32 2.0, %v150_v46 }
 0x236   : > { %v152_v50 = vmul.f32 %v627_v45, %v151_v49 }
 0x238   : > { %v153_v54 = vmul.f32 %v625_v39, %v152_v50 }
 0x23a   : > { %v164_v55 = vrot.slane %v153_v54, %v163_v51  ;;  %v157_v56 = vrot.slane %v153_v54, %v156_v52 }
 0x23c   : > { %166 = vbcast.lane.b32.xlu0 %v164_v55, 256  ;;  %159 = vbcast.lane.b32.xlu1 %v157_v56, 256 }
 0x240   : > { %191 = vrot.lane.b32.xlu1 %v796_v26, %s813_s4 }
 0x2ae   : > { %v167_v59 = vpop.permute.xlu0 %166  ;;  %v160_v60 = vpop.permute.xlu1 %159 }
 0x2af   : > { %v169_v61 = vmul.f32 %v167_v59, %v910_v1  ;;  %v168_v62 = vmul.f32 %v160_v60, %v908_v0  ;;  %v562_v59 = vpack.c.bf16 %v949_v19, %v947_v18 }
 0x2b1   : > { %v178_v63 = vsel %vm170_vm3, %v169_v61, 0.0  ;;  %v171_v22 = vsel %vm170_vm3, %v168_v62, 0.0  ;;  %v565_v61 = vpack.c.bf16 %v953_v21, %v951_v20 }
 0x2b2   : > { %v179_v23 = vrot.slane %v178_v63, 4  ;;  %v172_v24 = vrot.slane %v171_v22, 4  ;;  %v192_v38 = vpop.permute.xlu1 %191 }
 0x2b4   : > { %v180_v25 = vadd.f32 %v179_v23, %v178_v63  ;;  %v173_v30 = vadd.f32 %v172_v24, %v171_v22 }
 0x2b6   : > { %v181_v31 = vrot.slane %v180_v25, 2  ;;  %v174_v32 = vrot.slane %v173_v30, 2 }
 0x2b8   : > { %v182_v26 = vadd.f32 %v181_v31, %v180_v25  ;;  %v175_v33 = vadd.f32 %v174_v32, %v173_v30 }
 0x2ba   : > { %v183_v34 = vrot.slane %v182_v26, 1  ;;  %v176_v35 = vrot.slane %v175_v33, 1 }
 0x2bc   : > { %v184_v36 = vadd.f32 %v183_v34, %v182_v26  ;;  %v177_v37 = vadd.f32 %v176_v35, %v175_v33 }
 0x2be   : > { %v188_v39 = vsel %vm187_vm4, %v184_v36, %v177_v37 }
 0x2bf   : > { %v194_v40 = vsel %vm170_vm3, %v188_v39, %v192_v38 }
 0x2c0   : > { %522 = vmatmul.mubr.msk.f32.vlgmr.msra.gmra.mrb[0].mxu0 %vm198_vm5, %v194_v40 }
 0x393   : > { %v268_v42 = vpop.f32.mrb[0].mxu0 }
 0x394   : > { %v272_v43 = vadd.f32 %v268_v42, %v197_v41  ;;  %v523_v45 = vpop.f32.mrb[1].mxu0 }
 0x396   : > { %v277_v46 = vadd.f32 %v919_v4, %v272_v43 }
 0x398   : > { %628 = vtanh.f32 %v277_v46  ;;  %v483_v48 = vmul.f32 -1.442695, %v277_v46 }
 0x39a   : > { %630 = vpow2.f32 %v483_v48 }
 0x3a2   : > { %v629_v47 = vpop.eup %628 }
 0x3a3   : > { %291 = vrot.lane.b32.xlu1 %v629_v47, %s814_s22 }
 0x3a4   : > { %v631_v49 = vpop.eup %630 }
 0x3a5   : > { %v281_v50 = vadd.f32 1.0, %v631_v49 }
 0x3a7   : > { %286 = vrot.lane.b32.xlu1 %v788_v28, %s813_s4  ;;  %632 = vrcp.f32 %v281_v50  ;;  %v559_v28 = vpack.c.bf16 %v945_v17, %v943_v16 }
 0x3a9   : > { %560 = vmatpush3.bf16.msra.mxu1 %v559_v28 }
 0x3aa   : > { %561 = vmatprep.subr.bf16.mxu1 %v810_v44 }
 0x3ad   : > { %563 = vmatpush3.bf16.msra.mxu1 %v562_v59 }
 0x3ae   : > { %564 = vmatprep.subr.bf16.mxu1 %v810_v44 }
 0x3b1   : > { %v633_v51 = vpop.eup %632  ;;  %566 = vmatpush3.bf16.msra.mxu1 %v565_v61 }
 0x415   : > { %v292_v52 = vpop.permute.xlu1 %291 }
 0x416   : > { %v294_v53 = vmul.f32 %v633_v51, %v292_v52 }
 0x418   : > { %296 = vrot.lane.b32.xlu0 %v294_v53, %s813_s4 }
 0x419   : > { %v287_v54 = vpop.permute.xlu1 %286 }
 0x41a   : > { %v289_v55 = vmul.f32 %v633_v51, %v287_v54 }
 0x48a   : > { %v297_v56 = vpop.permute.xlu0 %296 }
 0x48b   : > { %v299_v57 = vadd.f32 %v297_v56, %v289_v55 }
 0x48d   : > { %634 = vtanh.f32 %v299_v57 }
 0x497   : > { %v635_v60 = vpop.eup %634 }
 0x498   : > { %302 = vrot.lane.b32.xlu1 %v635_v60, %s814_s22 }
 0x49c   : > { %311 = vrot.lane.b32.xlu1 %v792_v27, %s813_s4 }
 0x4a0   : > { %400 = vrot.lane.b32.xlu1 %v784_v29, %s813_s4 }
 0x50a   : > { %v303_v62 = vpop.permute.xlu1 %302 }
 0x50b   : > { %v305_v63 = vmul.f32 %v633_v51, %v303_v62 }
 0x50d   : > { %307 = vrot.lane.b32.xlu0 %v305_v63, %s813_s4 }
 0x50e   : > { %v312_v22 = vpop.permute.xlu1 %311 }
 0x512   : > { %v401_v35 = vpop.permute.xlu1 %400 }
 0x57f   : > { %v308_v23 = vpop.permute.xlu0 %307  }
 0x580   : > { %v314_v24 = vsel %vm170_vm3, %v308_v23, %v312_v22  ;;  %435 = vst.msk [vmem:[#allocation2] sm:$0x3] (%p120_p4), %vm84_vm0, %v308_v23 }
 0x581   : > { %541 = vmatmul.mubr.msk.f32.vlgmr.msra.gmra.mrb[0].mxu1 %vm198_vm5, %v314_v24 }
 0x654   : > { %v388_v25 = vpop.f32.mrb[0].mxu1 }
 0x655   : > { %v389_v44 = vadd.f32 %v921_v5, %v388_v25  ;;  %v542_v30 = vpop.f32.mrb[1].mxu1 }
 0x657   : > { %636 = vtanh.f32 %v389_v44  ;;  %v486_v27 = vmul.f32 -1.442695, %v389_v44 }
 0x659   : > { %638 = vpow2.f32 %v486_v27 }
 0x661   : > { %v637_v31 = vpop.eup %636 }
 0x662   : > { %405 = vrot.lane.b32.xlu0 %v637_v31, %s814_s22 }
 0x663   : > { %v639_v29 = vpop.eup %638 }
 0x664   : > { %v395_v32 = vadd.f32 1.0, %v639_v29 }
 0x666   : > { %640 = vrcp.f32 %v395_v32 }
 0x670   : > { %v641_v26 = vpop.eup %640 }
 0x671   : > { %v403_v36 = vmul.f32 %v641_v26, %v401_v35 }
 0x6d4   : > { %v406_v33 = vpop.permute.xlu0 %405 }
 0x6d5   : > { %v408_v34 = vmul.f32 %v641_v26, %v406_v33 }
 0x6d7   : > { %410 = vrot.lane.b32.xlu0 %v408_v34, %s813_s4 }
 0x749   : > { %v411_v37 = vpop.permute.xlu0 %410 }
 0x74a   : > { %v413_v38 = vadd.f32 %v411_v37, %v403_v36 }
 0x74c   : > { %642 = vtanh.f32 %v413_v38 }
 0x756   : > { %v643_v39 = vpop.eup %642 }
 0x757   : > { %416 = vrot.lane.b32.xlu1 %v643_v39, %s814_s22 }
 0x75b   : > { %427 = vrot.lane.b32.xlu1 %v299_v57, %s815_s23 }
 0x7c9   : > { %v417_v40 = vpop.permute.xlu1 %416 }
 0x7ca   : > { %v419_v41 = vmul.f32 %v641_v26, %v417_v40  ;;  %v1080_v26 = vmov %v308_v23 }
 0x7cc   : > { %421 = vrot.lane.b32.xlu0 %v419_v41, %s813_s4 }
 0x7cd   : > { %v428_v42 = vpop.permute.xlu1 %427  }
 0x7ce   : > { %v1078_v28 = vmov %v428_v42  ;;  %436 = vst.msk [vmem:[#allocation2 + $0x4] sm:$0x3] (%p120_p4), %vm84_vm0, %v428_v42 }
 0x7d0   : > { %431 = vrot.lane.b32.xlu0 %v413_v38, %s815_s23 }
 0x83d   :  { %122 = sbr.rel (!%p120_p4) target bundleno = 92 (0x5c), region = 72 }
 0x83e   : > { %v422_v43 = vpop.permute.xlu0 %421  }
 0x83f   : > { %425 = vst.msk [vmem:[%s424_s24] sm:$0x3] %vm84_vm0, %v422_v43  ;;  %v1079_v27 = vmov %v422_v43  ;;  %437 = vst.msk [vmem:[#allocation2 + $0x2] sm:$0x3] (%p120_p4), %vm84_vm0, %v422_v43 }
 0x842   : > { %v432_v45 = vpop.permute.xlu0 %431  }
 0x843   : > { %v1077_v29 = vmov %v432_v45  ;;  %438 = vst.msk [vmem:[#allocation2 + $0x6] sm:$0x3] (%p120_p4), %vm84_vm0, %v432_v45 }
 0x844   :  { %743 = shalt.err (!%p740_p9)
}
 0x845   :  { %s744_s7 = scalar_lea.hbm %s1076_s5, 256 }
 0x846   :  { %p745_p10 = scmp.ne.s32.totalorder %s1076_s5, %s744_s7  ;;  %p748_p11 = scmp.lt.u32.totalorder %s744_s7, %s1076_s5 }
 0x848   :  { %p750_p12 = pnand %p748_p11, %p745_p10 }
 0x84a   :  { %753 = shalt.err (!%p750_p12)
}
 0x84b   :  { %450 = dma.vmem_to_hbm [thread:$0]  %s445_s26, 256, %s1076_s5, [#allocation5], %s803_s28, %s803_s28, %s804_s29  }
 0x84c   :  { %780 = dma.done.wait [#allocation5], 256  }
 0x84d   :  { %781 = vsyncadd [#allocation5], 4294967040 }
 0x84e   :  { %454 = vsyncpa [#allocation4], 1 }
 0x84f   :  { %455 = vsyncpa [#allocation7], 1 }
 0x850   :  { %456 = vsyncpa [#allocation10], 1 }
 0x851   :  { %457 = vsyncpa [#allocation5], 1 }

</bundles_post_ra>
